<compile_context>
chip_gen: v6e
topology: v6e:2x2x1
jax: 0.10.0
libtpu: 0.0.40
codegen_flags: <defaults>
</compile_context>

<pallas_src>
import jax
import jax.numpy as jnp
from jax.experimental import pallas as pl
from jax.experimental.pallas import tpu as pltpu


def _attention_kernel(x_ref, w_ref, out_ref, attn_ref):
    # x_ref:    (Bt, T, D)  block of batch rows (input dtype)
    # w_ref:    (1, D)      lane-dense linear weight (input dtype)
    # out_ref:  (Bt, T, D)  x * softmax(x @ W^T)
    # attn_ref: (Bt, 1, T)  lane-dense attention weights
    x = x_ref[...]
    w = w_ref[...]                                     # (1, D)

    # scores[b, t] = sum_d x[b, t, d] * w[d]
    # product stays in the input dtype; accumulate the reduction in f32.
    scores = jnp.sum((x * w).astype(jnp.float32), axis=-1)       # (Bt, T) f32

    # numerically-stable softmax over the sequence axis (lane reductions), f32
    m = jnp.max(scores, axis=-1, keepdims=True)                  # (Bt, 1)
    e = jnp.exp(scores - m)                                      # (Bt, T)
    s = jnp.sum(e, axis=-1, keepdims=True)                       # (Bt, 1)
    p = e / s                                                    # exact softmax

    # lane-dense, unmasked store of the attention weights
    attn_ref[...] = p[:, None, :].astype(attn_ref.dtype)

    # final broadcast multiply in the input dtype (bf16 stays bf16)
    p_x = p.astype(x.dtype)
    out_ref[...] = (x * p_x[:, :, None]).astype(out_ref.dtype)


def _device_budget():
    """Return (vmem_limit_bytes, num_tensorcores_per_chip) for the current TPU."""
    vmem_bytes = 128 * 1024 * 1024
    try:
        info = pltpu.get_tpu_info()
        cap = int(getattr(info, "vmem_capacity_bytes", 0) or 0)
        if cap > 0:
            vmem_bytes = cap
    except Exception:
        pass
    kind = ""
    try:
        kind = jax.devices()[0].device_kind.lower()
    except Exception:
        pass
    is_v7x_class = ("v7" in kind) or ("7x" in kind) or (vmem_bytes <= 64 * 1024 * 1024)
    if is_v7x_class:
        # v7x: 64 MiB VMEM per TensorCore, 2 TCs per chip.
        vmem_limit = min(48 * 1024 * 1024, (vmem_bytes * 3) // 4)
        num_tc = 2
    else:
        # v5e / v6e: 128 MiB VMEM, single TensorCore.
        vmem_limit = min(96 * 1024 * 1024, (vmem_bytes * 3) // 4)
        num_tc = 1
    return int(vmem_limit), num_tc


def _pick_block_b(B, T, D, itemsize, vmem_limit_bytes, num_tc):
    """Pick how many batch rows each grid step processes.

    Largest divisor of B whose double-buffered (x-in + out + attn) tiles fit
    ~80% of the VMEM limit.  On multi-TensorCore chips, additionally guarantee
    a >=2-step (preferably even) grid so the 'parallel' axis shards across
    cores; on single-TC chips never shrink below the largest fitting divisor
    (extra grid steps are pure per-step overhead there).
    """
    per_b = (2 * T * D + T) * itemsize          # x tile + out tile + attn row
    budget = (vmem_limit_bytes * 4) // 5        # ~20% headroom for scratch/weight

    fit = 0
    for cand in range(B, 0, -1):
        if B % cand == 0 and 2 * cand * per_b <= budget:   # double-buffered
            fit = cand
            break
    if fit == 0:
        # TODO(synk): T-tiling two-pass softmax path for oversized batch rows.
        raise ValueError(
            "A single batch row needs {} bytes (double-buffered), exceeding the "
            "VMEM budget of {} bytes; T-tiling is not implemented.".format(
                2 * per_b, budget))

    if num_tc >= 2 and B >= 2:
        steps = B // fit
        if steps < 2 or steps % 2 == 1:
            best = 0
            # prefer an even number of >=2 steps (no straggler TensorCore)
            for cand in range(fit, 0, -1):
                if B % cand == 0 and (B // cand) >= 2 and (B // cand) % 2 == 0:
                    best = cand
                    break
            if best == 0 and steps < 2:
                # odd B: fall back to any >=2-step split
                for cand in range(fit - 1, 0, -1):
                    if B % cand == 0 and B // cand >= 2:
                        best = cand
                        break
            if best:
                fit = best
    return fit


def attention_forward(x, weight):
    """x: (B, T, D); weight: (1, D) (PyTorch nn.Linear(input_dim, 1) layout).

    Returns (weighted_input (B, T, D), attn_weights (B, T, 1))."""
    B, T, D = x.shape
    w = jnp.asarray(weight).reshape(1, D).astype(x.dtype)   # lane-dense weight
    itemsize = jnp.dtype(x.dtype).itemsize

    vmem_limit, num_tc = _device_budget()
    block_b = _pick_block_b(B, T, D, itemsize, vmem_limit, num_tc)
    grid = (B // block_b,)

    out_shapes = (
        jax.ShapeDtypeStruct((B, T, D), x.dtype),
        jax.ShapeDtypeStruct((B, 1, T), x.dtype),            # lane-dense attn
    )

    grid_spec = pltpu.PrefetchScalarGridSpec(
        num_scalar_prefetch=0,
        grid=grid,
        in_specs=[
            pl.BlockSpec((block_b, T, D), lambda b: (b, 0, 0)),
            pl.BlockSpec((1, D), lambda b: (0, 0)),
        ],
        out_specs=(
            pl.BlockSpec((block_b, T, D), lambda b: (b, 0, 0)),
            pl.BlockSpec((block_b, 1, T), lambda b: (b, 0, 0)),
        ),
    )

    cost = pl.CostEstimate(
        flops=3 * B * T * D,                       # x*w reduce + x*p multiply
        transcendentals=B * T,                     # exp
        bytes_accessed=2 * B * T * D * itemsize + B * T * itemsize + D * itemsize,
    )

    weighted, attn_lane = pl.pallas_call(
        _attention_kernel,
        out_shape=out_shapes,
        grid_spec=grid_spec,
        compiler_params=pltpu.CompilerParams(
            dimension_semantics=("parallel",),
            vmem_limit_bytes=vmem_limit,
        ),
        cost_estimate=cost,
    )(x, w)

    # (B, 1, T) -> (B, T, 1) is a free row-major relabel (same flat layout)
    attn = attn_lane.reshape(B, T, 1)
    return weighted, attn


def attention_reference(x, weight):
    # Pure-JAX reference mirroring the PyTorch forward.
    scores = jnp.einsum("btd,od->bto", x, weight)     # (B, T, 1)
    attn = jax.nn.softmax(scores, axis=1)             # softmax over T
    return x * attn, attn


if __name__ == "__main__":
    key = jax.random.PRNGKey(0)
    kx, kw = jax.random.split(key)

    B, T, D = 2, 8, 32
    x = jax.random.normal(kx, (B, T, D), dtype=jnp.float32)

    # Deterministic init mimicking nn.Linear default: U(-1/sqrt(D), 1/sqrt(D))
    bound = 1.0 / jnp.sqrt(jnp.float32(D))
    weight = jax.random.uniform(kw, (1, D), dtype=jnp.float32,
                                minval=-bound, maxval=bound)

    weighted, attn = attention_forward(x, weight)
    jax.block_until_ready((weighted, attn))

    ref_weighted, ref_attn = attention_reference(x, weight)
    assert weighted.shape == (B, T, D) and attn.shape == (B, T, 1)
    assert jnp.allclose(attn, ref_attn, atol=1e-5, rtol=1e-5)
    assert jnp.allclose(weighted, ref_weighted, atol=1e-5, rtol=1e-5)
    assert jnp.allclose(jnp.sum(attn, axis=1), 1.0, atol=1e-5)

    print("KERNEL_OK")
</pallas_src>

<mosaic_0001>
module attributes {stable_mosaic.version = 11 : i64} {
  func.func @_attention_kernel(%arg0: i32, %arg1: memref<2x8x32xf32, #tpu.memory_space<vmem>>, %arg2: memref<1x32xf32, #tpu.memory_space<vmem>>, %arg3: memref<2x8x32xf32, #tpu.memory_space<vmem>>, %arg4: memref<2x1x8xf32, #tpu.memory_space<vmem>>) attributes {dimension_semantics = [#tpu.dimension_semantics<parallel>], iteration_bounds = array<i64: 1>, scalar_prefetch = 0 : i64, scratch_operands = 0 : i64, tpu.core_type = #tpu.core_type<tc>, window_params = [{transform_indices = @transform_0, window_bounds = array<i64: 2, 8, 32>}, {pipeline_mode = #tpu.pipeline_mode<synchronous>, transform_indices = @transform_1, window_bounds = array<i64: 1, 32>}, {transform_indices = @transform_2, window_bounds = array<i64: 2, 8, 32>}, {transform_indices = @transform_3, window_bounds = array<i64: 2, 1, 8>}]} {
    %c0 = arith.constant 0 : index
    %c0_0 = arith.constant 0 : index
    %c0_1 = arith.constant 0 : index
    %0 = vector.load %arg1[%c0, %c0_0, %c0_1] : memref<2x8x32xf32, #tpu.memory_space<vmem>>, vector<2x8x32xf32>
    %c0_2 = arith.constant 0 : index
    %c0_3 = arith.constant 0 : index
    %1 = vector.load %arg2[%c0_2, %c0_3] : memref<1x32xf32, #tpu.memory_space<vmem>>, vector<1x32xf32>
    %2 = vector.shape_cast %1 : vector<1x32xf32> to vector<1x1x32xf32>
    %3 = vector.broadcast %2 : vector<1x1x32xf32> to vector<2x8x32xf32>
    %4 = arith.mulf %0, %3 : vector<2x8x32xf32>
    %cst = arith.constant dense<0.000000e+00> : vector<2x8xf32>
    %5 = vector.multi_reduction <add>, %4, %cst [2] : vector<2x8x32xf32> to vector<2x8xf32>
    %cst_4 = arith.constant dense<0xFF800000> : vector<2xf32>
    %6 = vector.multi_reduction <maximumf>, %5, %cst_4 [1] : vector<2x8xf32> to vector<2xf32>
    %7 = vector.shape_cast %6 : vector<2xf32> to vector<2x1xf32>
    %8 = vector.broadcast %7 : vector<2x1xf32> to vector<2x8xf32>
    %9 = arith.subf %5, %8 : vector<2x8xf32>
    %10 = math.exp %9 : vector<2x8xf32>
    %cst_5 = arith.constant dense<0.000000e+00> : vector<2xf32>
    %11 = vector.multi_reduction <add>, %10, %cst_5 [1] : vector<2x8xf32> to vector<2xf32>
    %12 = vector.shape_cast %11 : vector<2xf32> to vector<2x1xf32>
    %13 = vector.broadcast %12 : vector<2x1xf32> to vector<2x8xf32>
    %14 = arith.divf %10, %13 : vector<2x8xf32>
    %15 = vector.shape_cast %14 : vector<2x8xf32> to vector<2x1x8xf32>
    %c0_6 = arith.constant 0 : index
    %c0_7 = arith.constant 0 : index
    %c0_8 = arith.constant 0 : index
    %16 = vector.load %arg4[%c0_6, %c0_7, %c0_8] : memref<2x1x8xf32, #tpu.memory_space<vmem>>, vector<2x1x8xf32>
    tpu.vector_store %arg4[%c0_6, %c0_7, %c0_8], %15 {strides = array<i32>} : memref<2x1x8xf32, #tpu.memory_space<vmem>>, vector<2x1x8xf32>,
    %17 = vector.shape_cast %14 : vector<2x8xf32> to vector<2x8x1xf32>
    %18 = vector.broadcast %17 : vector<2x8x1xf32> to vector<2x8x32xf32>
    %19 = arith.mulf %0, %18 : vector<2x8x32xf32>
    %c0_9 = arith.constant 0 : index
    %c0_10 = arith.constant 0 : index
    %c0_11 = arith.constant 0 : index
    %20 = vector.load %arg3[%c0_9, %c0_10, %c0_11] : memref<2x8x32xf32, #tpu.memory_space<vmem>>, vector<2x8x32xf32>
    tpu.vector_store %arg3[%c0_9, %c0_10, %c0_11], %19 {strides = array<i32>} : memref<2x8x32xf32, #tpu.memory_space<vmem>>, vector<2x8x32xf32>,
    return
  }
  func.func @transform_0(%arg0: i32) -> (i32, i32, i32) {
    %c0_i32 = arith.constant 0 : i32
    %c0_i32_0 = arith.constant 0 : i32
    %c0_i32_1 = arith.constant 0 : i32
    return %arg0, %c0_i32, %c0_i32_0 : i32, i32, i32
  }
  func.func @transform_1(%arg0: i32) -> (i32, i32) {
    %c0_i32 = arith.constant 0 : i32
    %c0_i32_0 = arith.constant 0 : i32
    %c0_i32_1 = arith.constant 0 : i32
    return %c0_i32, %c0_i32_0 : i32, i32
  }
  func.func @transform_2(%arg0: i32) -> (i32, i32, i32) {
    %c0_i32 = arith.constant 0 : i32
    %c0_i32_0 = arith.constant 0 : i32
    %c0_i32_1 = arith.constant 0 : i32
    return %arg0, %c0_i32, %c0_i32_0 : i32, i32, i32
  }
  func.func @transform_3(%arg0: i32) -> (i32, i32, i32) {
    %c0_i32 = arith.constant 0 : i32
    %c0_i32_0 = arith.constant 0 : i32
    %c0_i32_1 = arith.constant 0 : i32
    return %arg0, %c0_i32, %c0_i32_0 : i32, i32, i32
  }
}

</mosaic_0001>

<bundles_post_ra>
// kernel: tpu_custom_call.1
= control target key start
LH: loop header
LB: loop body
LE: loop exit
PB: predicated region body
PF: predicated region fallthrough
CT: control target
= control target key end

     0   :  { %9 = vsyncpa [#allocation3], 0  ;;  %s322_s0 = inlined_call_operand.hbm [shape: f32[2,8,32], index: 0, kind: input, shape index: {}]   ;;  %s323_s1 = inlined_call_operand.vmem [shape: f32[1,32], index: 1, kind: input, shape index: {}]   ;;  %s324_s2 = inlined_call_operand.hbm [shape: f32[2,8,32], index: 2, kind: output, shape index: {0}]   ;;  %s325_s3 = inlined_call_operand.hbm [shape: f32[2,1,8], index: 3, kind: output, shape index: {1}]  }
   0x1   :  { %10 = vsyncpa [#allocation4], 0 }
   0x2   :  { %11 = vsyncpa [#allocation7], 0  ;;  %s264_s12 = smov [#allocation2]  }
   0x3   :  { %s17_s13 = sshll.u32 %s264_s12, 4  ;;  %s18_s13 = int_to_ptr.vmem [resolvable:$true] %s17_s13 }
   0x4   :  { %s206_s14 = scalar_lea.vmem %s18_s13, 256  ;;  %p211_p1 = scmp.lt.s32.totalorder %s18_s13, %s18_s13 }
   0x5   :  { %p207_p0 = scmp.ne.s32.totalorder %s18_s13, %s206_s14  ;;  %p212_p2 = scmp.lt.s32.totalorder %s206_s14, %s206_s14 }
   0x7   :  { %p213_p3 = por %p212_p2, %p211_p1 }
   0x9   :  { %p214_p4 = pnand %p213_p3, %p207_p0 }
   0xb   :  { %217 = shalt.err (!%p214_p4)
}
   0xc   :  { %s265_s15 = smov 128   ;;  %s266_s16 = smov 8  }
   0xd   :  { %23 = dma.hbm_to_vmem [thread:$0]  %s322_s0, 256, %s18_s13, [#allocation3], %s265_s15, %s265_s15, %s266_s16  }
   0xe   :  { %258 = dma.done.wait [#allocation3], 256  }
   0xf   :  { %259 = vsyncadd [#allocation3], 4294967040  ;;  %v29_v0 = vld [vmem:[#allocation2] sm:$0xff]  ;;  %vm40_vm0 = vcmask 261120   ;;  %v301_v2 = vld [vmem:[#allocation2 + $0x8] sm:$0xff]  ;;  %v49_v7 = vlaneseq  ;;  %vm59_vm1 = vcmask 1041409  }
  0x10   :  { %v179_v1 = vld [vmem:[%s323_s1] ss:$0 sm:$0xff]  ;;  %vm62_vm2 = vcmask 58368   ;;  %v267_v17 = vmov 0   ;;  %vm137_vm3 = vcmask 57344   ;;  %s268_s0 = smov [#allocation5]  }
  0x11   :  { %v38_v3 = vmul.f32 %v179_v1, %v29_v0  ;;  %v39_v4 = vmul.f32 %v179_v1, %v301_v2  ;;  %v50_v8 = vand.u32 127, %v49_v7  ;;  %v52_v9 = vshrl.u32 %v49_v7, 7  ;;  %189 = vset.pattern.permute.xlu0 %v267_v17  ;;  %188 = vset.pattern.permute.xlu1 %v267_v17  ;;  %s151_s1 = sshll.u32 %s268_s0, 4  ;;  %s269_s21 = smov [#allocation6]   ;;  %s152_s1 = int_to_ptr.vmem [resolvable:$true] %s151_s1 }
  0x12   :  { %s163_s22 = sshll.u32 %s269_s21, 4  ;;  %s218_s23 = scalar_lea.vmem %s152_s1, 256  ;;  %s164_s22 = int_to_ptr.vmem [resolvable:$true] %s163_s22 }
  0x13   :  { %v41_v5 = vsel %vm40_vm0, %v38_v3, 0.0  ;;  %v44_v6 = vsel %vm40_vm0, %v39_v4, 0.0  ;;  %v53_v11 = vsub.s32 %v50_v8, %v52_v9  ;;  %v69_v18 = vsub.s32 0, %v52_v9  ;;  %p219_p5 = scmp.ne.s32.totalorder %s152_s1, %s218_s23  ;;  %p223_p6 = scmp.lt.s32.totalorder %s152_s1, %s152_s1 }
  0x14   :  { %42 = vadd.xlane.f32.xlu0 %v41_v5  ;;  %v73_v19 = vsub.s32 1, %v52_v9  ;;  %p224_p7 = scmp.lt.s32.totalorder %s218_s23, %s218_s23 }
  0x16   :  { %p225_p8 = por %p224_p7, %p223_p6 }
  0x18   :  { %45 = vadd.xlane.f32.xlu0 %v44_v6  ;;  %p226_p9 = pnand %p225_p8, %p219_p5 }
  0x9d   :  { %v43_v10 = vpop.xlane.xlu0 %42 }
  0x9e   :  { %v54_v13 = vrot.slane %v43_v10, %v53_v11 }
  0xa1   :  { %v46_v12 = vpop.xlane.xlu0 %45 }
  0xa2   :  { %v58_v14 = vrot.slane %v46_v12, %v53_v11 }
  0xa4   :  { %v60_v15 = vsel %vm59_vm1, %v58_v14, %v54_v13 }
  0xa5   :  { %v63_v16 = vsel %vm62_vm2, %v60_v15, -inf }
  0xa6   :  { %64 = vmax.xlane.f32.xlu1 %v63_v16 }
 0x12f   :  { %v65_v20 = vpop.xlane.xlu1 %64 }
 0x130   :  { %v70_v21 = vrot.slane %v65_v20, %v69_v18  ;;  %v74_v22 = vrot.slane %v65_v20, %v73_v19 }
 0x132   :  { %v77_v23 = vsub.f32 %v43_v10, %v70_v21  ;;  %v78_v24 = vsub.f32 %v46_v12, %v74_v22 }
 0x134   :  { %v79_v25 = vmul.f32 1.442695, %v77_v23  ;;  %v81_v26 = vmul.f32 1.442695, %v78_v24 }
 0x136   :  { %190 = vpow2.f32 %v79_v25 }
 0x137   :  { %192 = vpow2.f32 %v81_v26 }
 0x143   :  { %v191_v27 = vpop.eup %190 }
 0x144   :  { %v193_v28 = vpop.eup %192  ;;  %86 = vperm.xlu1 %188, %v191_v27  }
 0x145   :  { %89 = vperm.xlu0 %189, %v193_v28  }
 0x1bf   :  { %v87_v29 = vpop.permute.xlu1 %86 }
 0x1c0   :  { %v90_v30 = vpop.permute.xlu0 %89  ;;  %v94_v31 = vrot.slane %v87_v29, %v53_v11 }
 0x1c1   :  { %v98_v32 = vrot.slane %v90_v30, %v53_v11 }
 0x1c3   :  { %v99_v33 = vsel %vm59_vm1, %v98_v32, %v94_v31 }
 0x1c4   :  { %v101_v34 = vsel %vm62_vm2, %v99_v33, 0.0 }
 0x1c5   :  { %102 = vadd.xlane.f32.xlu1 %v101_v34 }
 0x24e   :  { %v103_v35 = vpop.xlane.xlu1 %102 }
 0x24f   :  { %v108_v36 = vrot.slane %v103_v35, %v69_v18  ;;  %v112_v37 = vrot.slane %v103_v35, %v73_v19 }
 0x251   :  { %194 = vrcp.f32 %v108_v36 }
 0x252   :  { %196 = vrcp.f32 %v112_v37 }
 0x25e   :  { %v195_v38 = vpop.eup %194 }
 0x25f   :  { %v116_v39 = vmul.f32 %v195_v38, %v191_v27  ;;  %v197_v40 = vpop.eup %196 }
 0x260   :  { %v118_v41 = vmul.f32 %v197_v40, %v193_v28 }
 0x261   :  { %122 = vperm.xlu0 %189, %v116_v39  }
 0x265   :  { %125 = vperm.xlu0 %189, %v118_v41  }
 0x2dc   :  { %v123_v42 = vpop.permute.xlu0 %122 }
 0x2dd   :  { %v130_v43 = vrot.slane %v123_v42, %v53_v11  ;;  %v142_v44 = vmul.f32 %v123_v42, %v29_v0 }
 0x2df   :  { %138 = vst.msk [vmem:[#allocation6] sm:$0x1] %vm137_vm3, %v130_v43 }
 0x2e0   :  { %144 = vst.msk [vmem:[#allocation5] sm:$0xff] %vm40_vm0, %v142_v44  ;;  %v126_v45 = vpop.permute.xlu0 %125 }
 0x2e1   :  { %v134_v46 = vrot.slane %v126_v45, %v53_v11  ;;  %v143_v47 = vmul.f32 %v126_v45, %v301_v2 }
 0x2e3   :  { %139 = vst.msk [vmem:[#allocation6 + $0x1] sm:$0x1] %vm137_vm3, %v134_v46 }
 0x2e4   :  { %145 = vst.msk [vmem:[#allocation5 + $0x8] sm:$0xff] %vm40_vm0, %v143_v47 }
 0x2e5   :  { %229 = shalt.err (!%p226_p9)
}
 0x2e6   :  { %157 = dma.vmem_to_hbm [thread:$0]  %s152_s1, 256, %s324_s2, [#allocation4], %s265_s15, %s265_s15, %s266_s16  }
 0x2e7   :  { %s238_s26 = scalar_lea.vmem %s164_s22, 32  ;;  %p243_p11 = scmp.lt.s32.totalorder %s164_s22, %s164_s22 }
 0x2e8   :  { %p239_p10 = scmp.ne.s32.totalorder %s164_s22, %s238_s26  ;;  %p244_p12 = scmp.lt.s32.totalorder %s238_s26, %s238_s26 }
 0x2ea   :  { %p245_p13 = por %p244_p12, %p243_p11 }
 0x2ec   :  { %p246_p0 = pnand %p245_p13, %p239_p10 }
 0x2ee   :  { %249 = shalt.err (!%p246_p0)
}
 0x2ef   :  { %s270_s27 = smov 16   ;;  %s271_s28 = smov 1  }
 0x2f0   :  { %169 = dma.vmem_to_hbm [thread:$0]  %s164_s22, 32, %s325_s3, [#allocation7], %s270_s27, %s270_s27, %s271_s28  }
 0x2f1   :  { %260 = dma.done.wait [#allocation4], 256  }
 0x2f2   :  { %261 = vsyncadd [#allocation4], 4294967040 }
 0x2f3   :  { %262 = dma.done.wait [#allocation7], 32  }
 0x2f4   :  { %263 = vsyncadd [#allocation7], 4294967264 }
 0x2f5   :  { %176 = vsyncpa [#allocation3], 1 }
 0x2f6   :  { %177 = vsyncpa [#allocation4], 1 }
 0x2f7   :  { %178 = vsyncpa [#allocation7], 1 }

</bundles_post_ra>
